<compile_context>
chip_gen: v6e
topology: v6e:2x2x1
jax: 0.10.0
libtpu: 0.0.40
codegen_flags: <defaults>
</compile_context>

<pallas_src>
import jax
import jax.numpy as jnp
from jax import lax
from jax.experimental import pallas as pl
from jax.experimental.pallas import tpu as pltpu


def _mlp_edge_kernel(src_ref, dst_ref, p_ref, b1_ref, w2_ref, b2_ref, out_ref):
    # src_ref, dst_ref : [1, TE] int32   (edge endpoints for this tile)
    # p_ref            : [F, 2*Np] f32   (resident: [P_a | P_b], Np = padded N)
    # b1_ref, w2_ref   : [F, 1]    f32   (resident)
    # b2_ref           : (1,)      f32   (SMEM scalar)
    # out_ref          : [2, TE]   f32   (row 0 = score, row 1 = label)
    two_n = p_ref.shape[1]
    n_pad = two_n // 2
    te = src_ref.shape[1]

    # One-hot gather matrix fed to the MXU: column e selects P_a[:, src[e]]
    # (rows [0, Np)) and P_b[:, dst[e]] (rows [Np, 2*Np)).
    row_ids = lax.broadcasted_iota(jnp.int32, (two_n, te), 0)
    sel = jnp.logical_or(row_ids == src_ref[...],
                         row_ids == dst_ref[...] + n_pad).astype(jnp.float32)

    # Layer 1: gather + W1 application fused into one K=2N matmul.
    z1 = jnp.dot(p_ref[...], sel,
                 preferred_element_type=jnp.float32) + b1_ref[...]     # [F, TE]
    a1 = jnp.maximum(z1, 0.0)                                          # ReLU

    # Layer 2: VPU multiply + cross-sublane (XLU) reduction — no N=1 matmul.
    score = jnp.sum(a1 * w2_ref[...], axis=0, keepdims=True) + b2_ref[0]
    out_ref[0:1, :] = score                                            # [1, TE]
    # round(sigmoid(x)) == (x > 0): sigmoid(x) >= 0.5 <=> x >= 0, and the
    # x == 0 tie rounds to 0 either way.
    out_ref[1:2, :] = (score > 0.0).astype(jnp.float32)


def mlp_predictor_edges(h, src, dst, w1, b1, w2, b2, *, edge_tile=512):
    """Per-edge (score, label) of MLPPredictor.

    h   : [N, F]  node features (f32)
    src : [E]     source node index per edge
    dst : [E]     destination node index per edge
    w1  : [2F, F], b1 : [F]      (W1 stored transposed vs torch.nn.Linear)
    w2  : [F, 1],  b2 : [1]
    returns (score [E] f32, label [E] f32)
    """
    n_nodes, f = h.shape
    e = src.shape[0]
    assert w1.shape == (2 * f, f) and w2.shape == (f, 1)
    assert f % 8 == 0, "h_feats should be a multiple of 8 (sublane tiling)"
    assert edge_tile % 128 == 0, "edge_tile must be a multiple of 128 lanes"

    # Pad the edge list to a multiple of edge_tile; padded edges point at
    # node 0 and their outputs are sliced off below.
    e_pad = pl.cdiv(e, edge_tile) * edge_tile
    if e_pad != e:
        pad = e_pad - e
        src = jnp.concatenate([src, jnp.zeros((pad,), src.dtype)])
        dst = jnp.concatenate([dst, jnp.zeros((pad,), dst.dtype)])
    src2 = src.reshape(1, e_pad).astype(jnp.int32)
    dst2 = dst.reshape(1, e_pad).astype(jnp.int32)

    # Fold W1 into a once-per-call node-level precompute (N << E):
    #   P_a = (h @ W1a)^T, P_b = (h @ W1b)^T,  P = [P_a | P_b]  -> [F, 2*Np]
    n_pad = ((n_nodes + 7) // 8) * 8
    hp = lax.Precision.HIGHEST
    p_a = jnp.dot(h, w1[:f, :], precision=hp).T.astype(jnp.float32)    # [F, N]
    p_b = jnp.dot(h, w1[f:, :], precision=hp).T.astype(jnp.float32)    # [F, N]
    if n_pad != n_nodes:
        zp = jnp.zeros((f, n_pad - n_nodes), jnp.float32)
        p_a = jnp.concatenate([p_a, zp], axis=1)
        p_b = jnp.concatenate([p_b, zp], axis=1)
    p_cat = jnp.concatenate([p_a, p_b], axis=1)                        # [F, 2*Np]
    # One-hot MXU gather assumes a small, VMEM-resident node table.
    assert 2 * n_pad <= 4096, "use a DMA row gather for large node counts"

    b1_col = b1.reshape(f, 1).astype(jnp.float32)
    w2_col = w2.reshape(f, 1).astype(jnp.float32)
    b2_s = b2.reshape(1).astype(jnp.float32)

    grid = (e_pad // edge_tile,)

    out = pl.pallas_call(
        _mlp_edge_kernel,
        out_shape=jax.ShapeDtypeStruct((2, e_pad), jnp.float32),
        grid_spec=pltpu.PrefetchScalarGridSpec(
            num_scalar_prefetch=0,
            grid=grid,
            in_specs=[
                pl.BlockSpec((1, edge_tile), lambda i: (0, i)),        # src tile
                pl.BlockSpec((1, edge_tile), lambda i: (0, i)),        # dst tile
                pl.BlockSpec((f, 2 * n_pad), lambda i: (0, 0)),        # P (resident)
                pl.BlockSpec((f, 1), lambda i: (0, 0)),                # b1 column
                pl.BlockSpec((f, 1), lambda i: (0, 0)),                # w2 column
                pl.BlockSpec(memory_space=pltpu.MemorySpace.SMEM),     # b2 scalar
            ],
            out_specs=pl.BlockSpec((2, edge_tile), lambda i: (0, i)),  # score|label
        ),
        compiler_params=pltpu.CompilerParams(
            dimension_semantics=("parallel",)),
    )(src2, dst2, p_cat, b1_col, w2_col, b2_s)

    return out[0, :e], out[1, :e]


def _reference(h, src, dst, w1, b1, w2, b2):
    """Pure-JAX f32 reference matching the PyTorch module."""
    hp = lax.Precision.HIGHEST
    hcat = jnp.concatenate([h[src], h[dst]], axis=1)
    z1 = jnp.dot(hcat, w1, precision=hp) + b1
    a1 = jnp.maximum(z1, 0.0)
    score = (jnp.dot(a1, w2, precision=hp) + b2)[:, 0]
    label = jnp.round(jax.nn.sigmoid(score))
    return score, label


if __name__ == "__main__":
    key = jax.random.PRNGKey(0)
    k_h, k_w1, k_b1, k_w2, k_b2, k_src, k_dst = jax.random.split(key, 7)

    h_feats = 32        # hidden size
    n_nodes = 64        # graph nodes
    n_edges = 1000      # graph edges (NOT a multiple of edge_tile -> padding path)

    # Node features.
    h = jax.random.normal(k_h, (n_nodes, h_feats), dtype=jnp.float32)

    # Deterministic graph structure (src/dst node index per edge).
    src = jax.random.randint(k_src, (n_edges,), 0, n_nodes, dtype=jnp.int32)
    dst = jax.random.randint(k_dst, (n_edges,), 0, n_nodes, dtype=jnp.int32)

    # Deterministic parameter init mimicking nn.Linear's U(-1/sqrt(fan_in), ...).
    bound1 = 1.0 / (2 * h_feats) ** 0.5
    w1 = jax.random.uniform(k_w1, (2 * h_feats, h_feats), jnp.float32,
                            -bound1, bound1)
    b1 = jax.random.uniform(k_b1, (h_feats,), jnp.float32, -bound1, bound1)
    bound2 = 1.0 / h_feats ** 0.5
    w2 = jax.random.uniform(k_w2, (h_feats, 1), jnp.float32, -bound2, bound2)
    b2 = jax.random.uniform(k_b2, (1,), jnp.float32, -bound2, bound2)

    score, label = mlp_predictor_edges(h, src, dst, w1, b1, w2, b2,
                                       edge_tile=512)
    jax.block_until_ready((score, label))

    # Sanity check vs. pure-JAX f32 reference.
    ref_score, ref_label = _reference(h, src, dst, w1, b1, w2, b2)
    assert score.shape == (n_edges,) and label.shape == (n_edges,)
    assert jnp.allclose(score, ref_score, atol=1e-4, rtol=1e-4), \
        float(jnp.max(jnp.abs(score - ref_score)))
    # Labels may only differ where the score is within float noise of 0.
    label_ok = (label == ref_label) | (jnp.abs(ref_score) < 1e-4)
    assert bool(jnp.all(label_ok))

    print("KERNEL_OK")
</pallas_src>

<mosaic_0001>
module attributes {stable_mosaic.version = 11 : i64} {
  func.func @_mlp_edge_kernel(%arg0: i32, %arg1: memref<1x512xi32, #tpu.memory_space<vmem>>, %arg2: memref<1x512xi32, #tpu.memory_space<vmem>>, %arg3: memref<32x128xf32, #tpu.memory_space<vmem>>, %arg4: memref<32x1xf32, #tpu.memory_space<vmem>>, %arg5: memref<32x1xf32, #tpu.memory_space<vmem>>, %arg6: memref<1xf32, #tpu.memory_space<smem>>, %arg7: memref<2x512xf32, #tpu.memory_space<vmem>>) attributes {dimension_semantics = [#tpu.dimension_semantics<parallel>], iteration_bounds = array<i64: 2>, scalar_prefetch = 0 : i64, scratch_operands = 0 : i64, tpu.core_type = #tpu.core_type<tc>, window_params = [{transform_indices = @transform_0, window_bounds = array<i64: 1, 512>}, {transform_indices = @transform_1, window_bounds = array<i64: 1, 512>}, {pipeline_mode = #tpu.pipeline_mode<synchronous>, transform_indices = @transform_2, window_bounds = array<i64: 32, 128>}, {pipeline_mode = #tpu.pipeline_mode<synchronous>, transform_indices = @transform_3, window_bounds = array<i64: 32, 1>}, {pipeline_mode = #tpu.pipeline_mode<synchronous>, transform_indices = @transform_4, window_bounds = array<i64: 32, 1>}, {transform_indices = @transform_5, window_bounds = array<i64: 1>}, {transform_indices = @transform_6, window_bounds = array<i64: 2, 512>}]} {
    %0 = tpu.iota {dimensions = array<i32: 0>} : vector<128x512xi32>
    %c0 = arith.constant 0 : index
    %c0_0 = arith.constant 0 : index
    %1 = vector.load %arg1[%c0, %c0_0] : memref<1x512xi32, #tpu.memory_space<vmem>>, vector<1x512xi32>
    %2 = vector.broadcast %1 : vector<1x512xi32> to vector<128x512xi32>
    %3 = arith.cmpi eq, %0, %2 : vector<128x512xi32>
    %c0_1 = arith.constant 0 : index
    %c0_2 = arith.constant 0 : index
    %4 = vector.load %arg2[%c0_1, %c0_2] : memref<1x512xi32, #tpu.memory_space<vmem>>, vector<1x512xi32>
    %c64_i32 = arith.constant 64 : i32
    %5 = vector.broadcast %c64_i32 : i32 to vector<1x512xi32>
    %6 = arith.addi %4, %5 : vector<1x512xi32>
    %7 = vector.broadcast %6 : vector<1x512xi32> to vector<128x512xi32>
    %8 = arith.cmpi eq, %0, %7 : vector<128x512xi32>
    %9 = arith.ori %3, %8 : vector<128x512xi1>
    %10 = arith.extui %9 : vector<128x512xi1> to vector<128x512xi32>
    %11 = arith.sitofp %10 : vector<128x512xi32> to vector<128x512xf32>
    %c0_3 = arith.constant 0 : index
    %c0_4 = arith.constant 0 : index
    %12 = vector.load %arg3[%c0_3, %c0_4] : memref<32x128xf32, #tpu.memory_space<vmem>>, vector<32x128xf32>
    %cst = arith.constant dense<0.000000e+00> : vector<32x512xf32>
    %13 = tpu.matmul %12, %11, %cst {dimension_numbers = #tpu.dot_dimension_numbers<[1], [0], [0], [1], [0, 0, 1, 1], [], []>} : vector<32x128xf32>, vector<128x512xf32>, vector<32x512xf32> -> vector<32x512xf32>
    %c0_5 = arith.constant 0 : index
    %c0_6 = arith.constant 0 : index
    %14 = vector.load %arg4[%c0_5, %c0_6] : memref<32x1xf32, #tpu.memory_space<vmem>>, vector<32x1xf32>
    %15 = vector.broadcast %14 : vector<32x1xf32> to vector<32x512xf32>
    %16 = arith.addf %13, %15 : vector<32x512xf32>
    %cst_7 = arith.constant 0.000000e+00 : f32
    %17 = vector.broadcast %cst_7 : f32 to vector<32x512xf32>
    %18 = arith.maximumf %16, %17 : vector<32x512xf32>
    %c0_8 = arith.constant 0 : index
    %c0_9 = arith.constant 0 : index
    %19 = vector.load %arg5[%c0_8, %c0_9] : memref<32x1xf32, #tpu.memory_space<vmem>>, vector<32x1xf32>
    %20 = vector.broadcast %19 : vector<32x1xf32> to vector<32x512xf32>
    %21 = arith.mulf %18, %20 : vector<32x512xf32>
    %cst_10 = arith.constant dense<0.000000e+00> : vector<512xf32>
    %22 = vector.multi_reduction <add>, %21, %cst_10 [0] : vector<32x512xf32> to vector<512xf32>
    %23 = vector.shape_cast %22 : vector<512xf32> to vector<1x512xf32>
    %c0_11 = arith.constant 0 : index
    %24 = memref.load %arg6[%c0_11] : memref<1xf32, #tpu.memory_space<smem>>
    %25 = vector.broadcast %24 : f32 to vector<1x512xf32>
    %26 = arith.addf %23, %25 : vector<1x512xf32>
    %c0_12 = arith.constant 0 : index
    %c0_13 = arith.constant 0 : index
    %27 = vector.load %arg7[%c0_12, %c0_13] : memref<2x512xf32, #tpu.memory_space<vmem>>, vector<1x512xf32>
    tpu.vector_store %arg7[%c0_12, %c0_13], %26 {strides = array<i32>} : memref<2x512xf32, #tpu.memory_space<vmem>>, vector<1x512xf32>,
    %cst_14 = arith.constant 0.000000e+00 : f32
    %28 = vector.broadcast %cst_14 : f32 to vector<1x512xf32>
    %29 = arith.cmpf ogt, %26, %28 : vector<1x512xf32>
    %30 = arith.extui %29 : vector<1x512xi1> to vector<1x512xi32>
    %31 = arith.sitofp %30 : vector<1x512xi32> to vector<1x512xf32>
    %c1 = arith.constant 1 : index
    %c0_15 = arith.constant 0 : index
    %32 = vector.load %arg7[%c1, %c0_15] : memref<2x512xf32, #tpu.memory_space<vmem>>, vector<1x512xf32>
    tpu.vector_store %arg7[%c1, %c0_15], %31 {strides = array<i32>} : memref<2x512xf32, #tpu.memory_space<vmem>>, vector<1x512xf32>,
    return
  }
  func.func @transform_0(%arg0: i32) -> (i32, i32) {
    %c0_i32 = arith.constant 0 : i32
    %c0_i32_0 = arith.constant 0 : i32
    return %c0_i32, %arg0 : i32, i32
  }
  func.func @transform_1(%arg0: i32) -> (i32, i32) {
    %c0_i32 = arith.constant 0 : i32
    %c0_i32_0 = arith.constant 0 : i32
    return %c0_i32, %arg0 : i32, i32
  }
  func.func @transform_2(%arg0: i32) -> (i32, i32) {
    %c0_i32 = arith.constant 0 : i32
    %c0_i32_0 = arith.constant 0 : i32
    %c0_i32_1 = arith.constant 0 : i32
    return %c0_i32, %c0_i32_0 : i32, i32
  }
  func.func @transform_3(%arg0: i32) -> (i32, i32) {
    %c0_i32 = arith.constant 0 : i32
    %c0_i32_0 = arith.constant 0 : i32
    %c0_i32_1 = arith.constant 0 : i32
    return %c0_i32, %c0_i32_0 : i32, i32
  }
  func.func @transform_4(%arg0: i32) -> (i32, i32) {
    %c0_i32 = arith.constant 0 : i32
    %c0_i32_0 = arith.constant 0 : i32
    %c0_i32_1 = arith.constant 0 : i32
    return %c0_i32, %c0_i32_0 : i32, i32
  }
  func.func @transform_5(%arg0: i32) -> i32 {
    %c0_i32 = arith.constant 0 : i32
    %c0_i32_0 = arith.constant 0 : i32
    return %c0_i32 : i32
  }
  func.func @transform_6(%arg0: i32) -> (i32, i32) {
    %c0_i32 = arith.constant 0 : i32
    %c0_i32_0 = arith.constant 0 : i32
    return %c0_i32, %arg0 : i32, i32
  }
}

</mosaic_0001>

<bundles_post_ra>
// kernel: tpu_custom_call.1
= control target key start
LH: loop header
LB: loop body
LE: loop exit
PB: predicated region body
PF: predicated region fallthrough
CT: control target
= control target key end

     0   :  { %s1780_s0 = inlined_call_operand.vmem [shape: s32[1,1024], index: 0, kind: input, shape index: {}]   ;;  %s1781_s1 = inlined_call_operand.vmem [shape: s32[1,1024], index: 1, kind: input, shape index: {}]   ;;  %s1782_s2 = inlined_call_operand.vmem [shape: f32[32,128], index: 2, kind: input, shape index: {}]   ;;  %s1783_s3 = inlined_call_operand.vmem [shape: f32[32,1], index: 3, kind: input, shape index: {}]   ;;  %s1784_s4 = inlined_call_operand.vmem [shape: f32[32,1], index: 4, kind: input, shape index: {}]   ;;  %s1785_s5 = inlined_call_operand.<no memory space> [shape: f32[1], index: 5, kind: input, shape index: {}]   ;;  %s1786_s6 = inlined_call_operand.hbm [shape: f32[2,1024], index: 6, kind: output, shape index: {}]  }
   0x1   :  { %11 = sst [smem:[#allocation2]] %s1785_s5 }
   0x2   :  { %12 = vsyncpa [#allocation4], 0 }
   0x3   :  { %14 = vsyncpa [#allocation4 + $0x1], 0  ;;  %s1399_s23 = smov 0   ;;  %s1401_s24 = smov 0  }
   0x4   :  { %s1403_s25 = smov 0   ;;  %s1405_s26 = smov 0  }
   0x5 LB: > { %s1420_s5 = sadd.s32 4294967295, %s1354_s26   ;;  %s1103_s27 = sadd.s32 4294967294, %s1354_s26   ;;  %s1354_s26 = sphi %s1405_s26, %s1792_s26   ;;  %s1350_s25 = sphi %s1403_s25, %s1791_s25   ;;  %s1346_s24 = sphi %s1401_s24, %s1790_s24   ;;  %s1342_s23 = sphi %s1399_s23, %s1789_s23  }
   0x6   : > { %s1424_s28 = sadd.s32 1, %s1354_s26   ;;  %s163_s29 = sadd.s32 1, %s1350_s25 }
   0x7   : > { %s160_s30 = ssub.s32 %s1354_s26, %s1424_s28  ;;  %p173_p0 = scmp.ne.s32.totalorder %s1350_s25, %s1346_s24 }
   0x8   : > { %p161_p1 = scmp.eq.s32.totalorder %s160_s30, 0  ;;  %p174_p2 = scmp.eq.s32.totalorder %s1420_s5, 1 }
   0x9   : > { %p179_p3 = scmp.ne.s32.totalorder %s1346_s24, %s1342_s23  ;;  %p180_p4 = scmp.eq.s32.totalorder %s1103_s27, 1 }
   0xa   : > { %s1435_s7 = scalar_select %p161_p1, %s1350_s25, %s163_s29  }
   0xb   : > { %p1437_p5 = por %p174_p2, %p173_p0  ;;  %p1441_p6 = por %p180_p4, %p179_p3 }
   0xc   : > { %p1106_p7 = scmp.ge.s32.totalorder %s1354_s26, 1  ;;  %p226_p8 = scmp.lt.s32.totalorder %s1354_s26, 3 }
   0xe   : > { %p227_p9 = pnand %p1106_p7, %p226_p8 }
   0xf   : > { %s1108_s10 = sshll.u32 (!%p227_p9), %s1420_s5, 2  ;;  %s940_s30 = sld [smem:[#allocation2]] (!%p227_p9) }
  0x10   : > { %230 = sbr.rel (%p227_p9) target bundleno = 348 (0x15c), region = 44  ;;  %p260_p10 = scmp.lt.s32.totalorder (!%p227_p9), %s1108_s10, 7 }
  0x11   : > { %s256_s11 = sand.u32 (!%p227_p9), 1, %s1346_s24   ;;  %s1248_s12 = sshll.u32 (!%p227_p9), %s1420_s5, 7 }
  0x12   : > { %s1036_s17 = scalar_lea.hbm (!%p227_p9), %s1786_s6, %s1248_s12  ;;  %s1024_s18 = scalar_lea.sflag (!%p227_p9), [#allocation4], %s256_s11 }
  0x13   : > { %s1360_s5 = smov (!%p227_p9), [#allocation3]  }
  0x14   : > { %s1298_s20 = sshll.u32 (!%p227_p9), %s1360_s5, 4  ;;  %s1299_s20 = int_to_ptr.vmem [resolvable:$false] %s1298_s20 }
  0x15   : > { %v270_v0 = vlaneseq  ;;  %v1356_v1 = vmov 0.0   ;;  %v646_v2 = vld [vmem:[%s1783_s3] sm:$0xff]  ;;  %v648_v3 = vld [vmem:[%s1783_s3 + $0x10] sm:$0xff]  ;;  %v1357_v5 = vmov 0   ;;  %s1794_s10 = smov (!%p260_p10, %s1108_s10), 7  ;;  %v647_v9 = vld [vmem:[%s1783_s3 + $0x8] sm:$0xff] }
  0x16   : > { %734 = vmatprep.mubr.f32.mxu0 %v1356_v1  ;;  %823 = vmatprep.mubr.f32.mxu1 %v1356_v1  ;;  %v649_v10 = vld [vmem:[%s1783_s3 + $0x18] sm:$0xff]  ;;  %s262_s21 = scalar_lea.vmem %s1780_s0, %s1794_s10  ;;  %s267_s29 = scalar_lea.vmem %s1781_s1, %s1794_s10  ;;  %v864_v20 = vld [vmem:[%s1784_s4] sm:$0xff]  ;;  %v865_v24 = vld [vmem:[%s1784_s4 + $0x8] sm:$0xff]  ;;  %v1358_v27 = vmov 1.0  }
  0x17   : > { %v1457_v4 = vshrl.u32 %v270_v0, 7  ;;  %1292 = vset.pattern.permute.xlu0 %v1357_v5  ;;  %1293 = vset.pattern.permute.xlu1 %v1357_v5  ;;  %v287_v13 = vld [vmem:[%s262_s21] sm:$0xf]  ;;  %v866_v32 = vld [vmem:[%s1784_s4 + $0x10] sm:$0xff]  ;;  %v867_v33 = vld [vmem:[%s1784_s4 + $0x18] sm:$0xff]  ;;  %s1107_s10 = sshll.u32 %s256_s11, 3 }
  0x18   : > { %652 = vperm.xlu0 %1292, %v646_v2   ;;  %662 = vperm.xlu1 %1293, %v648_v3   ;;  %v368_v14 = vld [vmem:[%s267_s29] sm:$0xf]  ;;  %v643_v44 = vld [vmem:[%s1782_s2 + $0x8] sm:$0xff]  ;;  %v644_v45 = vld [vmem:[%s1782_s2 + $0x10] sm:$0xff]  ;;  %s258_s13 = scalar_lea.vmem [#allocation3], %s1107_s10  ;;  %s1300_s21 = scalar_lea.vmem %s1299_s20, 256 }
  0x19   : > { %v294_v6 = vsub.s32 1, %v1457_v4  ;;  %v302_v7 = vsub.s32 3, %v1457_v4  ;;  %v290_v8 = vsub.s32 0, %v1457_v4  ;;  %v286_v11 = vadd.s32 120, %v1457_v4  ;;  %v642_v43 = vld [vmem:[%s1782_s2] sm:$0xff]  ;;  %v645_v46 = vld [vmem:[%s1782_s2 + $0x18] sm:$0xff] }
  0x1a   : > { %v298_v12 = vsub.s32 2, %v1457_v4  ;;  %v369_v16 = vadd.s32 64, %v368_v14  ;;  %v285_v23 = vadd.s32 112, %v1457_v4  ;;  %v284_v28 = vadd.s32 104, %v1457_v4  ;;  %s1038_s14 = sshll.u32 %s258_s13, 4  ;;  %s1039_s14 = int_to_ptr.vmem [resolvable:$true] %s1038_s14 }
  0x1b   : > { %v1476_v15 = vrot.slane %v287_v13, %v294_v6  ;;  %v1478_v17 = vrot.slane %v287_v13, %v302_v7  ;;  %v1480_v18 = vrot.slane %v287_v13, %v290_v8  ;;  %v283_v29 = vadd.s32 96, %v1457_v4  ;;  %s1294_s19 = scalar_lea.vmem %s1039_s14, 128  ;;  %p1301_p0 = scmp.lt.s32.totalorder %s1039_s14, %s1299_s20 }
  0x1c   : > { %657 = vperm.xlu0 %1292, %v647_v9   ;;  %667 = vperm.xlu1 %1293, %v649_v10   ;;  %v1482_v19 = vrot.slane %v287_v13, %v298_v12  ;;  %v1488_v21 = vrot.slane %v369_v16, %v294_v6  ;;  %v1490_v22 = vrot.slane %v369_v16, %v302_v7  ;;  %v282_v30 = vadd.s32 88, %v1457_v4  ;;  %p1295_p11 = scmp.ne.s32.totalorder %s1039_s14, %s1294_s19  ;;  %p1302_p1 = scmp.lt.s32.totalorder %s1300_s21, %s1294_s19 }
  0x1d   : > { %vm365_vm0 = vcmp.eq.s32.totalorder %v286_v11, %v1476_v15  ;;  %vm367_vm1 = vcmp.eq.s32.totalorder %v286_v11, %v1478_v17  ;;  %v1497_v25 = vrot.slane %v369_v16, %v290_v8  ;;  %v1499_v26 = vrot.slane %v369_v16, %v298_v12 }
  0x1e   : > { %vm447_vm2 = vcmp.eq.s32.totalorder %v286_v11, %v1488_v21  ;;  %vm449_vm3 = vcmp.eq.s32.totalorder %v286_v11, %v1490_v22  ;;  %vm364_vm4 = vcmp.eq.s32.totalorder %v286_v11, %v1480_v18  ;;  %vm366_vm7 = vcmp.eq.s32.totalorder %v286_v11, %v1482_v19  ;;  %p1296_p12 = pnand %p1295_p11, %p1437_p5  ;;  %p1303_p2 = por %p1302_p1, %p1301_p0 }
  0x1f   : > { %vm511_vm5 = vmor %vm365_vm0, %vm447_vm2  ;;  %vm446_vm6 = vcmp.eq.s32.totalorder %v286_v11, %v1497_v25  ;;  %vm448_vm8 = vcmp.eq.s32.totalorder %v286_v11, %v1499_v26  ;;  %vm361_vm10 = vcmp.eq.s32.totalorder %v285_v23, %v1476_v15  ;;  %vm443_vm11 = vcmp.eq.s32.totalorder %v285_v23, %v1488_v21 }
  0x20   : > { %870 = vperm.xlu0 %1292, %v864_v20   ;;  %875 = vperm.xlu1 %1293, %v865_v24   ;;  %vm513_vm9 = vmor %vm367_vm1, %vm449_vm3  ;;  %vm363_vm13 = vcmp.eq.s32.totalorder %v285_v23, %v1478_v17  ;;  %vm445_vm14 = vcmp.eq.s32.totalorder %v285_v23, %v1490_v22  ;;  %vm360_vm0 = vcmp.eq.s32.totalorder %v285_v23, %v1480_v18  ;;  %v281_v31 = vadd.s32 80, %v1457_v4  ;;  %p1297_p13 = pneg %p1296_p12 }
  0x21   : > { %1174 = vmatprep.subr.msk.mxu0 %vm511_vm5, %v1358_v27  ;;  %1206 = vmatprep.subr.msk.mxu1 %vm513_vm9, %v1358_v27  ;;  %vm510_vm12 = vmor %vm364_vm4, %vm446_vm6  ;;  %vm442_vm1 = vcmp.eq.s32.totalorder %v285_v23, %v1497_v25  ;;  %vm362_vm3 = vcmp.eq.s32.totalorder %v285_v23, %v1482_v19  ;;  %vm444_vm5 = vcmp.eq.s32.totalorder %v285_v23, %v1499_v26  ;;  %v280_v34 = vadd.s32 72, %v1457_v4 }
  0x22   : > { %1175 = vmatpush1.msk.msra.mxu0 %vm510_vm12, %v1358_v27  ;;  %vm512_vm15 = vmor %vm366_vm7, %vm448_vm8  ;;  %vm357_vm6 = vcmp.eq.s32.totalorder %v284_v28, %v1476_v15  ;;  %vm439_vm9 = vcmp.eq.s32.totalorder %v284_v28, %v1488_v21  ;;  %vm359_vm8 = vcmp.eq.s32.totalorder %v284_v28, %v1478_v17  ;;  %vm356_vm12 = vcmp.eq.s32.totalorder %v284_v28, %v1480_v18  ;;  %p1304_p3 = pnand %p1303_p2, %p1297_p13 }
  0x23   : > { %1207 = vmatpush1.msk.msra.mxu1 %vm512_vm15, %v1358_v27  ;;  %vm507_vm2 = vmor %vm361_vm10, %vm443_vm11  ;;  %vm441_vm10 = vcmp.eq.s32.totalorder %v284_v28, %v1490_v22  ;;  %vm358_vm15 = vcmp.eq.s32.totalorder %v284_v28, %v1482_v19  ;;  %v279_v35 = vadd.s32 64, %v1457_v4  ;;  %v278_v36 = vadd.s32 56, %v1457_v4 }
  0x24   : > { %1176 = vmatprep.subr.msk.mxu0 %vm507_vm2, %v1358_v27  ;;  %vm509_vm4 = vmor %vm363_vm13, %vm445_vm14  ;;  %vm438_vm13 = vcmp.eq.s32.totalorder %v284_v28, %v1497_v25  ;;  %vm440_vm2 = vcmp.eq.s32.totalorder %v284_v28, %v1499_v26  ;;  %880 = vperm.xlu0 %1292, %v866_v32   ;;  %v277_v37 = vadd.s32 48, %v1457_v4  ;;  %v276_v38 = vadd.s32 40, %v1457_v4 }
  0x25   : > { %1208 = vmatprep.subr.msk.mxu1 %vm509_vm4, %v1358_v27  ;;  %vm506_vm7 = vmor %vm360_vm0, %vm442_vm1  ;;  %vm353_vm1 = vcmp.eq.s32.totalorder %v283_v29, %v1476_v15  ;;  %vm435_vm4 = vcmp.eq.s32.totalorder %v283_v29, %v1488_v21  ;;  %885 = vperm.xlu1 %1293, %v867_v33   ;;  %v275_v39 = vadd.s32 32, %v1457_v4  ;;  %v274_v40 = vadd.s32 24, %v1457_v4 }
  0x26   : > { %1177 = vmatpush1.msk.msra.mxu0 %vm506_vm7, %v1358_v27  ;;  %vm508_vm11 = vmor %vm362_vm3, %vm444_vm5  ;;  %vm355_vm5 = vcmp.eq.s32.totalorder %v283_v29, %v1478_v17  ;;  %vm352_vm7 = vcmp.eq.s32.totalorder %v283_v29, %v1480_v18  ;;  %v273_v41 = vadd.s32 16, %v1457_v4  ;;  %v272_v42 = vadd.s32 8, %v1457_v4 }
  0x27   : > { %1209 = vmatpush1.msk.msra.mxu1 %vm508_vm11, %v1358_v27  ;;  %vm503_vm14 = vmor %vm357_vm6, %vm439_vm9  ;;  %vm437_vm6 = vcmp.eq.s32.totalorder %v283_v29, %v1490_v22  ;;  %vm354_vm11 = vcmp.eq.s32.totalorder %v283_v29, %v1482_v19 }
  0x28   : > { %1178 = vmatprep.subr.msk.mxu0 %vm503_vm14, %v1358_v27  ;;  %vm505_vm0 = vmor %vm359_vm8, %vm441_vm10  ;;  %vm434_vm8 = vcmp.eq.s32.totalorder %v283_v29, %v1497_v25  ;;  %vm436_vm14 = vcmp.eq.s32.totalorder %v283_v29, %v1499_v26 }
  0x29   : > { %1210 = vmatprep.subr.msk.mxu1 %vm505_vm0, %v1358_v27  ;;  %vm502_vm3 = vmor %vm356_vm12, %vm438_vm13  ;;  %vm349_vm13 = vcmp.eq.s32.totalorder %v282_v30, %v1476_v15  ;;  %vm431_vm0 = vcmp.eq.s32.totalorder %v282_v30, %v1488_v21 }
  0x2a   : > { %1179 = vmatpush1.msk.msra.mxu0 %vm502_vm3, %v1358_v27  ;;  %vm504_vm9 = vmor %vm358_vm15, %vm440_vm2  ;;  %vm351_vm2 = vcmp.eq.s32.totalorder %v282_v30, %v1478_v17  ;;  %vm348_vm3 = vcmp.eq.s32.totalorder %v282_v30, %v1480_v18 }
  0x2b   : > { %1211 = vmatpush1.msk.msra.mxu1 %vm504_vm9, %v1358_v27  ;;  %vm499_vm10 = vmor %vm353_vm1, %vm435_vm4  ;;  %vm433_vm1 = vcmp.eq.s32.totalorder %v282_v30, %v1490_v22  ;;  %vm350_vm9 = vcmp.eq.s32.totalorder %v282_v30, %v1482_v19 }
  0x2c   : > { %1180 = vmatprep.subr.msk.mxu0 %vm499_vm10, %v1358_v27  ;;  %vm501_vm12 = vmor %vm355_vm5, %vm437_vm6  ;;  %vm430_vm5 = vcmp.eq.s32.totalorder %v282_v30, %v1497_v25  ;;  %vm345_vm10 = vcmp.eq.s32.totalorder %v281_v31, %v1476_v15 }
  0x2d   : > { %1212 = vmatprep.subr.msk.mxu1 %vm501_vm12, %v1358_v27  ;;  %vm498_vm15 = vmor %vm352_vm7, %vm434_vm8  ;;  %vm432_vm7 = vcmp.eq.s32.totalorder %v282_v30, %v1499_v26  ;;  %vm427_vm12 = vcmp.eq.s32.totalorder %v281_v31, %v1488_v21 }
  0x2e   : > { %1181 = vmatpush1.msk.msra.mxu0 %vm498_vm15, %v1358_v27  ;;  %vm500_vm4 = vmor %vm354_vm11, %vm436_vm14  ;;  %vm347_vm14 = vcmp.eq.s32.totalorder %v281_v31, %v1478_v17  ;;  %vm344_vm15 = vcmp.eq.s32.totalorder %v281_v31, %v1480_v18 }
  0x2f   : > { %1213 = vmatpush1.msk.msra.mxu1 %vm500_vm4, %v1358_v27  ;;  %vm495_vm6 = vmor %vm349_vm13, %vm431_vm0  ;;  %vm429_vm13 = vcmp.eq.s32.totalorder %v281_v31, %v1490_v22  ;;  %vm346_vm4 = vcmp.eq.s32.totalorder %v281_v31, %v1482_v19 }
  0x30   : > { %1182 = vmatprep.subr.msk.mxu0 %vm495_vm6, %v1358_v27  ;;  %vm497_vm8 = vmor %vm351_vm2, %vm433_vm1  ;;  %vm426_vm2 = vcmp.eq.s32.totalorder %v281_v31, %v1497_v25  ;;  %vm428_vm6 = vcmp.eq.s32.totalorder %v281_v31, %v1499_v26 }
  0x31   : > { %1214 = vmatprep.subr.msk.mxu1 %vm497_vm8, %v1358_v27  ;;  %vm494_vm11 = vmor %vm348_vm3, %vm430_vm5  ;;  %vm341_vm5 = vcmp.eq.s32.totalorder %v280_v34, %v1476_v15  ;;  %vm423_vm8 = vcmp.eq.s32.totalorder %v280_v34, %v1488_v21 }
  0x32   : > { %1183 = vmatpush1.msk.msra.mxu0 %vm494_vm11, %v1358_v27  ;;  %vm496_vm0 = vmor %vm350_vm9, %vm432_vm7  ;;  %vm343_vm7 = vcmp.eq.s32.totalorder %v280_v34, %v1478_v17  ;;  %vm340_vm11 = vcmp.eq.s32.totalorder %v280_v34, %v1480_v18 }
  0x33   : > { %1215 = vmatpush1.msk.msra.mxu1 %vm496_vm0, %v1358_v27  ;;  %vm491_vm1 = vmor %vm345_vm10, %vm427_vm12  ;;  %vm425_vm10 = vcmp.eq.s32.totalorder %v280_v34, %v1490_v22  ;;  %vm342_vm0 = vcmp.eq.s32.totalorder %v280_v34, %v1482_v19 }
  0x34   : > { %1184 = vmatprep.subr.msk.mxu0 %vm491_vm1, %v1358_v27  ;;  %vm493_vm3 = vmor %vm347_vm14, %vm429_vm13  ;;  %vm422_vm14 = vcmp.eq.s32.totalorder %v280_v34, %v1497_v25  ;;  %vm424_vm1 = vcmp.eq.s32.totalorder %v280_v34, %v1499_v26 }
  0x35   : > { %1216 = vmatprep.subr.msk.mxu1 %vm493_vm3, %v1358_v27  ;;  %vm490_vm9 = vmor %vm344_vm15, %vm426_vm2  ;;  %vm337_vm2 = vcmp.eq.s32.totalorder %v279_v35, %v1476_v15  ;;  %vm419_vm3 = vcmp.eq.s32.totalorder %v279_v35, %v1488_v21 }
  0x36   : > { %1185 = vmatpush1.msk.msra.mxu0 %vm490_vm9, %v1358_v27  ;;  %vm492_vm12 = vmor %vm346_vm4, %vm428_vm6  ;;  %vm339_vm6 = vcmp.eq.s32.totalorder %v279_v35, %v1478_v17  ;;  %vm336_vm9 = vcmp.eq.s32.totalorder %v279_v35, %v1480_v18 }
  0x37   : > { %1217 = vmatpush1.msk.msra.mxu1 %vm492_vm12, %v1358_v27  ;;  %vm487_vm13 = vmor %vm341_vm5, %vm423_vm8  ;;  %vm421_vm5 = vcmp.eq.s32.totalorder %v279_v35, %v1490_v22  ;;  %vm338_vm12 = vcmp.eq.s32.totalorder %v279_v35, %v1482_v19 }
  0x38   : > { %1186 = vmatprep.subr.msk.mxu0 %vm487_vm13, %v1358_v27  ;;  %vm489_vm15 = vmor %vm343_vm7, %vm425_vm10  ;;  %vm418_vm7 = vcmp.eq.s32.totalorder %v279_v35, %v1497_v25  ;;  %vm420_vm13 = vcmp.eq.s32.totalorder %v279_v35, %v1499_v26 }
  0x39   : > { %1218 = vmatprep.subr.msk.mxu1 %vm489_vm15, %v1358_v27  ;;  %vm486_vm4 = vmor %vm340_vm11, %vm422_vm14  ;;  %vm333_vm14 = vcmp.eq.s32.totalorder %v278_v36, %v1476_v15  ;;  %vm415_vm15 = vcmp.eq.s32.totalorder %v278_v36, %v1488_v21 }
  0x3a   : > { %1187 = vmatpush1.msk.msra.mxu0 %vm486_vm4, %v1358_v27  ;;  %vm488_vm8 = vmor %vm342_vm0, %vm424_vm1  ;;  %vm335_vm1 = vcmp.eq.s32.totalorder %v278_v36, %v1478_v17  ;;  %vm332_vm4 = vcmp.eq.s32.totalorder %v278_v36, %v1480_v18 }
  0x3b   : > { %1219 = vmatpush1.msk.msra.mxu1 %vm488_vm8, %v1358_v27  ;;  %vm483_vm10 = vmor %vm337_vm2, %vm419_vm3  ;;  %vm417_vm2 = vcmp.eq.s32.totalorder %v278_v36, %v1490_v22  ;;  %vm334_vm8 = vcmp.eq.s32.totalorder %v278_v36, %v1482_v19 }
  0x3c   : > { %1188 = vmatprep.subr.msk.mxu0 %vm483_vm10, %v1358_v27  ;;  %vm485_vm11 = vmor %vm339_vm6, %vm421_vm5  ;;  %vm414_vm6 = vcmp.eq.s32.totalorder %v278_v36, %v1497_v25  ;;  %vm416_vm10 = vcmp.eq.s32.totalorder %v278_v36, %v1499_v26 }
  0x3d   : > { %1220 = vmatprep.subr.msk.mxu1 %vm485_vm11, %v1358_v27  ;;  %vm482_vm0 = vmor %vm336_vm9, %vm418_vm7  ;;  %vm329_vm7 = vcmp.eq.s32.totalorder %v277_v37, %v1476_v15  ;;  %vm411_vm11 = vcmp.eq.s32.totalorder %v277_v37, %v1488_v21 }
  0x3e   : > { %1189 = vmatpush1.msk.msra.mxu0 %vm482_vm0, %v1358_v27  ;;  %vm484_vm3 = vmor %vm338_vm12, %vm420_vm13  ;;  %vm331_vm13 = vcmp.eq.s32.totalorder %v277_v37, %v1478_v17  ;;  %vm328_vm0 = vcmp.eq.s32.totalorder %v277_v37, %v1480_v18 }
  0x3f   : > { %1221 = vmatpush1.msk.msra.mxu1 %vm484_vm3, %v1358_v27  ;;  %vm479_vm5 = vmor %vm333_vm14, %vm415_vm15  ;;  %vm413_vm14 = vcmp.eq.s32.totalorder %v277_v37, %v1490_v22  ;;  %vm330_vm3 = vcmp.eq.s32.totalorder %v277_v37, %v1482_v19 }
  0x40   : > { %1190 = vmatprep.subr.msk.mxu0 %vm479_vm5, %v1358_v27  ;;  %vm481_vm9 = vmor %vm335_vm1, %vm417_vm2  ;;  %vm410_vm1 = vcmp.eq.s32.totalorder %v277_v37, %v1497_v25  ;;  %vm412_vm5 = vcmp.eq.s32.totalorder %v277_v37, %v1499_v26 }
  0x41   : > { %1222 = vmatprep.subr.msk.mxu1 %vm481_vm9, %v1358_v27  ;;  %vm478_vm12 = vmor %vm332_vm4, %vm414_vm6  ;;  %vm325_vm6 = vcmp.eq.s32.totalorder %v276_v38, %v1476_v15  ;;  %vm407_vm9 = vcmp.eq.s32.totalorder %v276_v38, %v1488_v21 }
  0x42   : > { %1191 = vmatpush1.msk.msra.mxu0 %vm478_vm12, %v1358_v27  ;;  %vm480_vm15 = vmor %vm334_vm8, %vm416_vm10  ;;  %vm327_vm10 = vcmp.eq.s32.totalorder %v276_v38, %v1478_v17  ;;  %vm324_vm12 = vcmp.eq.s32.totalorder %v276_v38, %v1480_v18 }
  0x43   : > { %1223 = vmatpush1.msk.msra.mxu1 %vm480_vm15, %v1358_v27  ;;  %vm475_vm2 = vmor %vm329_vm7, %vm411_vm11  ;;  %vm409_vm7 = vcmp.eq.s32.totalorder %v276_v38, %v1490_v22  ;;  %vm326_vm15 = vcmp.eq.s32.totalorder %v276_v38, %v1482_v19 }
  0x44   : > { %1192 = vmatprep.subr.msk.mxu0 %vm475_vm2, %v1358_v27  ;;  %vm477_vm4 = vmor %vm331_vm13, %vm413_vm14  ;;  %vm406_vm13 = vcmp.eq.s32.totalorder %v276_v38, %v1497_v25  ;;  %vm408_vm2 = vcmp.eq.s32.totalorder %v276_v38, %v1499_v26 }
  0x45   : > { %1224 = vmatprep.subr.msk.mxu1 %vm477_vm4, %v1358_v27  ;;  %vm474_vm8 = vmor %vm328_vm0, %vm410_vm1  ;;  %vm321_vm1 = vcmp.eq.s32.totalorder %v275_v39, %v1476_v15  ;;  %vm403_vm4 = vcmp.eq.s32.totalorder %v275_v39, %v1488_v21 }
  0x46   : > { %1193 = vmatpush1.msk.msra.mxu0 %vm474_vm8, %v1358_v27  ;;  %vm476_vm11 = vmor %vm330_vm3, %vm412_vm5  ;;  %vm323_vm5 = vcmp.eq.s32.totalorder %v275_v39, %v1478_v17  ;;  %vm320_vm8 = vcmp.eq.s32.totalorder %v275_v39, %v1480_v18 }
  0x47   : > { %1225 = vmatpush1.msk.msra.mxu1 %vm476_vm11, %v1358_v27  ;;  %vm471_vm14 = vmor %vm325_vm6, %vm407_vm9  ;;  %vm405_vm6 = vcmp.eq.s32.totalorder %v275_v39, %v1490_v22  ;;  %vm322_vm11 = vcmp.eq.s32.totalorder %v275_v39, %v1482_v19 }
  0x48   : > { %1194 = vmatprep.subr.msk.mxu0 %vm471_vm14, %v1358_v27  ;;  %vm473_vm0 = vmor %vm327_vm10, %vm409_vm7  ;;  %vm402_vm10 = vcmp.eq.s32.totalorder %v275_v39, %v1497_v25  ;;  %vm404_vm14 = vcmp.eq.s32.totalorder %v275_v39, %v1499_v26 }
  0x49   : > { %1226 = vmatprep.subr.msk.mxu1 %vm473_vm0, %v1358_v27  ;;  %vm470_vm3 = vmor %vm324_vm12, %vm406_vm13  ;;  %vm317_vm13 = vcmp.eq.s32.totalorder %v274_v40, %v1476_v15  ;;  %vm399_vm0 = vcmp.eq.s32.totalorder %v274_v40, %v1488_v21 }
  0x4a   : > { %1195 = vmatpush1.msk.msra.mxu0 %vm470_vm3, %v1358_v27  ;;  %vm472_vm9 = vmor %vm326_vm15, %vm408_vm2  ;;  %vm319_vm2 = vcmp.eq.s32.totalorder %v274_v40, %v1478_v17  ;;  %vm316_vm3 = vcmp.eq.s32.totalorder %v274_v40, %v1480_v18 }
  0x4b   : > { %1227 = vmatpush1.msk.msra.mxu1 %vm472_vm9, %v1358_v27  ;;  %vm467_vm7 = vmor %vm321_vm1, %vm403_vm4  ;;  %vm401_vm1 = vcmp.eq.s32.totalorder %v274_v40, %v1490_v22  ;;  %vm318_vm9 = vcmp.eq.s32.totalorder %v274_v40, %v1482_v19 }
  0x4c   : > { %1196 = vmatprep.subr.msk.mxu0 %vm467_vm7, %v1358_v27  ;;  %vm469_vm12 = vmor %vm323_vm5, %vm405_vm6  ;;  %vm398_vm5 = vcmp.eq.s32.totalorder %v274_v40, %v1497_v25  ;;  %vm400_vm7 = vcmp.eq.s32.totalorder %v274_v40, %v1499_v26 }
  0x4d   : > { %1228 = vmatprep.subr.msk.mxu1 %vm469_vm12, %v1358_v27  ;;  %vm466_vm15 = vmor %vm320_vm8, %vm402_vm10  ;;  %vm313_vm10 = vcmp.eq.s32.totalorder %v273_v41, %v1476_v15  ;;  %vm395_vm12 = vcmp.eq.s32.totalorder %v273_v41, %v1488_v21 }
  0x4e   : > { %1197 = vmatpush1.msk.msra.mxu0 %vm466_vm15, %v1358_v27  ;;  %vm468_vm4 = vmor %vm322_vm11, %vm404_vm14  ;;  %vm315_vm14 = vcmp.eq.s32.totalorder %v273_v41, %v1478_v17  ;;  %vm312_vm15 = vcmp.eq.s32.totalorder %v273_v41, %v1480_v18 }
  0x4f   : > { %1229 = vmatpush1.msk.msra.mxu1 %vm468_vm4, %v1358_v27  ;;  %vm463_vm6 = vmor %vm317_vm13, %vm399_vm0  ;;  %vm397_vm13 = vcmp.eq.s32.totalorder %v273_v41, %v1490_v22  ;;  %vm314_vm4 = vcmp.eq.s32.totalorder %v273_v41, %v1482_v19 }
  0x50   : > { %1198 = vmatprep.subr.msk.mxu0 %vm463_vm6, %v1358_v27  ;;  %vm465_vm8 = vmor %vm319_vm2, %vm401_vm1  ;;  %vm394_vm2 = vcmp.eq.s32.totalorder %v273_v41, %v1497_v25  ;;  %vm396_vm6 = vcmp.eq.s32.totalorder %v273_v41, %v1499_v26 }
  0x51   : > { %1230 = vmatprep.subr.msk.mxu1 %vm465_vm8, %v1358_v27  ;;  %vm462_vm11 = vmor %vm316_vm3, %vm398_vm5  ;;  %vm309_vm5 = vcmp.eq.s32.totalorder %v272_v42, %v1476_v15  ;;  %vm391_vm8 = vcmp.eq.s32.totalorder %v272_v42, %v1488_v21 }
  0x52   : > { %1199 = vmatpush1.msk.msra.mxu0 %vm462_vm11, %v1358_v27  ;;  %vm464_vm0 = vmor %vm318_vm9, %vm400_vm7  ;;  %vm311_vm7 = vcmp.eq.s32.totalorder %v272_v42, %v1478_v17  ;;  %vm393_vm11 = vcmp.eq.s32.totalorder %v272_v42, %v1490_v22 }
  0x53   : > { %1231 = vmatpush1.msk.msra.mxu1 %vm464_vm0, %v1358_v27  ;;  %vm459_vm1 = vmor %vm313_vm10, %vm395_vm12  ;;  %vm308_vm12 = vcmp.eq.s32.totalorder %v272_v42, %v1480_v18  ;;  %vm390_vm0 = vcmp.eq.s32.totalorder %v272_v42, %v1497_v25 }
  0x54   : > { %1200 = vmatprep.subr.msk.mxu0 %vm459_vm1, %v1358_v27  ;;  %vm461_vm3 = vmor %vm315_vm14, %vm397_vm13  ;;  %vm310_vm13 = vcmp.eq.s32.totalorder %v272_v42, %v1482_v19  ;;  %vm392_vm1 = vcmp.eq.s32.totalorder %v272_v42, %v1499_v26 }
  0x55   : > { %1232 = vmatprep.subr.msk.mxu1 %vm461_vm3, %v1358_v27  ;;  %vm458_vm9 = vmor %vm312_vm15, %vm394_vm2  ;;  %vm305_vm2 = vcmp.eq.s32.totalorder %v1457_v4, %v1476_v15  ;;  %vm307_vm3 = vcmp.eq.s32.totalorder %v1457_v4, %v1478_v17 }
  0x56   : > { %1201 = vmatpush1.msk.msra.mxu0 %vm458_vm9, %v1358_v27  ;;  %vm460_vm10 = vmor %vm314_vm4, %vm396_vm6  ;;  %vm387_vm4 = vcmp.eq.s32.totalorder %v1457_v4, %v1488_v21  ;;  %vm304_vm9 = vcmp.eq.s32.totalorder %v1457_v4, %v1480_v18 }
  0x57   : > { %1233 = vmatpush1.msk.msra.mxu1 %vm460_vm10, %v1358_v27  ;;  %vm455_vm14 = vmor %vm309_vm5, %vm391_vm8  ;;  %vm389_vm5 = vcmp.eq.s32.totalorder %v1457_v4, %v1490_v22  ;;  %vm306_vm10 = vcmp.eq.s32.totalorder %v1457_v4, %v1482_v19 }
  0x58   : > { %1202 = vmatprep.subr.msk.mxu0 %vm455_vm14, %v1358_v27  ;;  %vm457_vm15 = vmor %vm311_vm7, %vm393_vm11  ;;  %vm386_vm7 = vcmp.eq.s32.totalorder %v1457_v4, %v1497_v25 }
  0x59   : > { %1234 = vmatprep.subr.msk.mxu1 %vm457_vm15, %v1358_v27  ;;  %vm454_vm6 = vmor %vm308_vm12, %vm390_vm0  ;;  %vm388_vm12 = vcmp.eq.s32.totalorder %v1457_v4, %v1499_v26 }
  0x5a   : > { %1203 = vmatpush1.msk.msra.mxu0 %vm454_vm6, %v1358_v27  ;;  %vm456_vm8 = vmor %vm310_vm13, %vm392_vm1  ;;  %vm977_vm6 = vcmp.lt.s32.totalorder %v270_v0, 512 }
  0x5b   : > { %1235 = vmatpush1.msk.msra.mxu1 %vm456_vm8, %v1358_v27  ;;  %vm451_vm11 = vmor %vm305_vm2, %vm387_vm4 }
  0x5c   : > { %1204 = vmatprep.subr.msk.mxu0 %vm451_vm11, %v1358_v27  ;;  %vm453_vm0 = vmor %vm307_vm3, %vm389_vm5 }
  0x5d   : > { %1236 = vmatprep.subr.msk.mxu1 %vm453_vm0, %v1358_v27  ;;  %vm450_vm14 = vmor %vm304_vm9, %vm386_vm7 }
  0x5e   : > { %1205 = vmatpush1.msk.msra.mxu0 %vm450_vm14, %v1358_v27  ;;  %vm452_vm13 = vmor %vm306_vm10, %vm388_vm12 }
  0x5f   : > { %1237 = vmatpush1.msk.msra.mxu1 %vm452_vm13, %v1358_v27  ;;  %735 = vmatmul.mubr.f32.vlgmr.msra.gmra.mxu0 %v642_v43 }
  0x60   : > { %824 = vmatmul.mubr.f32.vlgmr.msra.gmra.mxu1 %v642_v43  ;;  %740 = vmatprep.mubr.f32.mxu0 %v1356_v1 }
  0x61   : > { %829 = vmatprep.mubr.f32.mxu1 %v1356_v1 }
  0x63   : > { %741 = vmatmul.mubr.f32.gmra.mxu0 %v643_v44 }
  0x64   : > { %830 = vmatmul.mubr.f32.gmra.mxu1 %v643_v44  ;;  %746 = vmatprep.mubr.f32.mxu0 %v1356_v1 }
  0x65   : > { %835 = vmatprep.mubr.f32.mxu1 %v1356_v1 }
  0x67   : > { %747 = vmatmul.mubr.f32.gmra.mxu0 %v644_v45 }
  0x68   : > { %836 = vmatmul.mubr.f32.gmra.mxu1 %v644_v45  ;;  %752 = vmatprep.mubr.f32.mxu0 %v1356_v1 }
  0x69   : > { %841 = vmatprep.mubr.f32.mxu1 %v1356_v1 }
  0x6b   : > { %753 = vmatmul.mubr.f32.gmra.mxu0 %v645_v46 }
  0x6c   : > { %842 = vmatmul.mubr.f32.gmra.mxu1 %v645_v46 }
  0x93   : > { %v653_v47 = vpop.permute.xlu0 %652  ;;  %v663_v48 = vpop.permute.xlu1 %662 }
  0x97   : > { %v658_v49 = vpop.permute.xlu0 %657  ;;  %v668_v57 = vpop.permute.xlu1 %667 }
  0x9b   : > { %v871_v62 = vpop.permute.xlu0 %870  ;;  %v876_v19 = vpop.permute.xlu1 %875 }
  0x9f   : > { %v881_v29 = vpop.permute.xlu0 %880 }
 0x11f   : > { %v736_v50 = vpop.f32.mrf.mxu0 }
 0x120   : > { %v825_v51 = vpop.f32.mrf.mxu1  ;;  %v737_v52 = vadd.f32 %v736_v50, %v653_v47 }
 0x121   : > { %v826_v53 = vadd.f32 %v825_v51, %v653_v47  ;;  %v738_v54 = vpop.f32.mrf.mxu0  ;;  %v886_v51 = vpop.permute.xlu1 %885 }
 0x122   : > { %v739_v55 = vadd.f32 %v738_v54, %v653_v47  ;;  %v827_v56 = vpop.f32.mrf.mxu1  ;;  %v848_v63 = vmax.f32 %v737_v52, 0.0 }
 0x123   : > { %v828_v58 = vadd.f32 %v827_v56, %v653_v47  ;;  %v742_v59 = vpop.f32.mrf.mxu0  ;;  %v850_v2 = vmax.f32 %v826_v53, 0.0 }
 0x124   : > { %v743_v60 = vadd.f32 %v742_v59, %v658_v49  ;;  %v831_v61 = vpop.f32.mrf.mxu1  ;;  %v849_v6 = vmax.f32 %v739_v55, 0.0  ;;  %v888_v17 = vmul.f32 %v871_v62, %v848_v63 }
 0x125   : > { %v832_v3 = vadd.f32 %v831_v61, %v658_v49  ;;  %v744_v5 = vpop.f32.mrf.mxu0  ;;  %v851_v10 = vmax.f32 %v828_v58, 0.0  ;;  %v890_v18 = vmul.f32 %v871_v62, %v850_v2 }
 0x126   : > { %v852_v7 = vmax.f32 %v743_v60, 0.0  ;;  %v745_v8 = vadd.f32 %v744_v5, %v658_v49  ;;  %v833_v9 = vpop.f32.mrf.mxu1  ;;  %v889_v23 = vmul.f32 %v871_v62, %v849_v6 }
 0x127   : > { %v854_v11 = vmax.f32 %v832_v3, 0.0  ;;  %v834_v12 = vadd.f32 %v833_v9, %v658_v49  ;;  %v748_v13 = vpop.f32.mrf.mxu0  ;;  %v891_v28 = vmul.f32 %v871_v62, %v851_v10 }
 0x128   : > { %v853_v14 = vmax.f32 %v745_v8, 0.0  ;;  %v749_v15 = vadd.f32 %v748_v13, %v663_v48  ;;  %v837_v16 = vpop.f32.mrf.mxu1  ;;  %v892_v24 = vmul.f32 %v876_v19, %v852_v7 }
 0x129   : > { %v855_v20 = vmax.f32 %v834_v12, 0.0  ;;  %v838_v21 = vadd.f32 %v837_v16, %v663_v48  ;;  %v750_v22 = vpop.f32.mrf.mxu0  ;;  %v894_v30 = vmul.f32 %v876_v19, %v854_v11 }
 0x12a   : > { %v856_v25 = vmax.f32 %v749_v15, 0.0  ;;  %v751_v26 = vadd.f32 %v750_v22, %v663_v48  ;;  %v839_v27 = vpop.f32.mrf.mxu1  ;;  %v893_v34 = vmul.f32 %v876_v19, %v853_v14  ;;  %v904_v44 = vadd.f32 %v892_v24, %v888_v17 }
 0x12b   : > { %v858_v31 = vmax.f32 %v838_v21, 0.0  ;;  %v840_v32 = vadd.f32 %v839_v27, %v663_v48  ;;  %v754_v33 = vpop.f32.mrf.mxu0  ;;  %v895_v39 = vmul.f32 %v876_v19, %v855_v20  ;;  %v922_v50 = vadd.f32 %v894_v30, %v890_v18 }
 0x12c   : > { %v896_v35 = vmul.f32 %v881_v29, %v856_v25  ;;  %v857_v36 = vmax.f32 %v751_v26, 0.0  ;;  %v755_v37 = vadd.f32 %v754_v33, %v668_v57  ;;  %v843_v38 = vpop.f32.mrf.mxu1  ;;  %v913_v54 = vadd.f32 %v893_v34, %v889_v23 }
 0x12d   : > { %v898_v40 = vmul.f32 %v881_v29, %v858_v31  ;;  %v859_v41 = vmax.f32 %v840_v32, 0.0  ;;  %v844_v42 = vadd.f32 %v843_v38, %v668_v57  ;;  %v756_v43 = vpop.f32.mrf.mxu0  ;;  %v931_v59 = vadd.f32 %v895_v39, %v891_v28 }
 0x12e   : > { %v897_v45 = vmul.f32 %v881_v29, %v857_v36  ;;  %v860_v46 = vmax.f32 %v755_v37, 0.0  ;;  %v757_v47 = vadd.f32 %v756_v43, %v668_v57  ;;  %v845_v49 = vpop.f32.mrf.mxu1  ;;  %v905_v55 = vadd.f32 %v904_v44, %v896_v35 }
 0x12f   : > { %v899_v52 = vmul.f32 %v881_v29, %v859_v41  ;;  %v862_v48 = vmax.f32 %v844_v42, 0.0  ;;  %v846_v53 = vadd.f32 %v845_v49, %v668_v57  ;;  %v923_v60 = vadd.f32 %v922_v50, %v898_v40 }
 0x130   : > { %v900_v56 = vmul.f32 %v886_v51, %v860_v46  ;;  %v861_v58 = vmax.f32 %v757_v47, 0.0  ;;  %v914_v63 = vadd.f32 %v913_v54, %v897_v45  ;;  %v1359_v21 = vmov 1966171168  }
 0x131   : > { %v902_v61 = vmul.f32 %v886_v51, %v862_v48  ;;  %v863_v62 = vmax.f32 %v846_v53, 0.0  ;;  %v932_v5 = vadd.f32 %v931_v59, %v899_v52  ;;  %v953_v22 = vunpack.c.l.s4 %v1359_v21 }
 0x132   : > { %v906_v2 = vadd.f32 %v905_v55, %v900_v56  ;;  %v901_v3 = vmul.f32 %v886_v51, %v861_v58  ;;  %v941_v27 = vstv %s940_s30 }
 0x133   : > { %v924_v6 = vadd.f32 %v923_v60, %v902_v61  ;;  %v903_v7 = vmul.f32 %v886_v51, %v863_v62  ;;  %v954_v32 = vunpack.c.0.s8 %v953_v22 }
 0x134   : > { %v907_v8 = vrot.slane %v906_v2, 4  ;;  %v915_v9 = vadd.f32 %v914_v63, %v901_v3 }
 0x135   : > { %v925_v10 = vrot.slane %v924_v6, 4  ;;  %v933_v11 = vadd.f32 %v932_v5, %v903_v7  ;;  %v957_v40 = vsub.s32 %v954_v32, %v1457_v4 }
 0x136   : > { %v908_v57 = vadd.f32 %v907_v8, %v906_v2  ;;  %v916_v12 = vrot.slane %v915_v9, 4 }
 0x137   : > { %v926_v13 = vadd.f32 %v925_v10, %v924_v6  ;;  %v934_v14 = vrot.slane %v933_v11, 4 }
 0x138   : > { %v909_v15 = vrot.slane %v908_v57, 2  ;;  %v917_v16 = vadd.f32 %v916_v12, %v915_v9 }
 0x139   : > { %v927_v17 = vrot.slane %v926_v13, 2  ;;  %v935_v18 = vadd.f32 %v934_v14, %v933_v11 }
 0x13a   : > { %v910_v19 = vadd.f32 %v909_v15, %v908_v57  ;;  %v918_v20 = vrot.slane %v917_v16, 2 }
 0x13b   : > { %v928_v23 = vadd.f32 %v927_v17, %v926_v13  ;;  %v936_v24 = vrot.slane %v935_v18, 2 }
 0x13c   : > { %v911_v25 = vrot.slane %v910_v19, 1  ;;  %v919_v26 = vadd.f32 %v918_v20, %v917_v16 }
 0x13d   : > { %v929_v28 = vrot.slane %v928_v23, 1  ;;  %v937_v29 = vadd.f32 %v936_v24, %v935_v18 }
 0x13e   : > { %v912_v30 = vadd.f32 %v911_v25, %v910_v19  ;;  %v920_v31 = vrot.slane %v919_v26, 1 }
 0x13f   : > { %v930_v33 = vadd.f32 %v929_v28, %v928_v23  ;;  %v938_v34 = vrot.slane %v937_v29, 1 }
 0x140   : > { %v942_v35 = vadd.f32 %v941_v27, %v912_v30  ;;  %v921_v36 = vadd.f32 %v920_v31, %v919_v26 }
 0x141   : > { %v944_v37 = vadd.f32 %v941_v27, %v930_v33  ;;  %v939_v38 = vadd.f32 %v938_v34, %v937_v29 }
 0x142   : > { %vm980_vm1 = vcmp.gt.f32.partialorder %v942_v35, 0.0  ;;  %v943_v39 = vadd.f32 %v941_v27, %v921_v36 }
 0x143   : > { %vm982_vm15 = vcmp.gt.f32.partialorder %v944_v37, 0.0  ;;  %v945_v41 = vadd.f32 %v941_v27, %v939_v38  ;;  %v1238_v43 = vsel %vm980_vm1, 1.0, %v1356_v1 }
 0x144   : > { %v950_v42 = vcombine.low %v942_v35, %v943_v39  ;;  %vm981_vm2 = vcmp.gt.f32.partialorder %v943_v39, 0.0  ;;  %v1240_v46 = vsel %vm982_vm15, 1.0, %v1356_v1 }
 0x145   : > { %v1239_v44 = vsel %vm981_vm2, 1.0, %v1356_v1  ;;  %v951_v45 = vcombine.low %v944_v37, %v945_v41  ;;  %vm983_vm4 = vcmp.gt.f32.partialorder %v945_v41, 0.0 }
 0x146   : > { %v1241_v47 = vsel %vm983_vm4, 1.0, %v1356_v1  ;;  %v958_v49 = vrot.slane %v950_v42, %v957_v40  ;;  %v996_v50 = vcombine.low %v1238_v43, %v1239_v44 }
 0x147   : > { %v965_v4 = vrot.slane %v951_v45, %v957_v40  ;;  %v997_v51 = vcombine.low %v1240_v46, %v1241_v47 }
 0x148   : > { %v1004_v52 = vrot.slane %v996_v50, %v957_v40 }
 0x149   : > { %v966_v48 = vcombine.low %v958_v49, %v965_v4  ;;  %v1011_v53 = vrot.slane %v997_v51, %v957_v40 }
 0x14b   : > { %v973_v54 = vrot.slane %v966_v48, %v957_v40  ;;  %v1012_v55 = vcombine.low %v1004_v52, %v1011_v53 }
 0x14d   : > { %979 = vst.msk [vmem:[%s258_s13] ss:$2 sm:$0xf] %vm977_vm6, %v973_v54  ;;  %v1019_v56 = vrot.slane %v1012_v55, %v957_v40 }
 0x14f   : > { %1242 = vst.msk [vmem:[%s258_s13 + $0x1] ss:$2 sm:$0xf] %vm977_vm6, %v1019_v56 }
 0x150   : > { %1307 = shalt.err (!%p1304_p3)
}
 0x151   : > { %s1308_s22 = scalar_lea.hbm %s1036_s17, 128  ;;  %s1312_s30 = scalar_lea.hbm %s1786_s6, 256 }
 0x152   : > { %p1309_p4 = scmp.ne.s32.totalorder %s1036_s17, %s1308_s22  ;;  %p1313_p9 = scmp.lt.s32.totalorder %s1036_s17, %s1786_s6 }
 0x153   : > { %p1314_p10 = scmp.lt.s32.totalorder %s1312_s30, %s1308_s22 }
 0x154   : > { %p1310_p7 = pnand %p1309_p4, %p1437_p5 }
 0x155   : > { %p1315_p11 = por %p1314_p10, %p1313_p9 }
 0x156   : > { %p1311_p8 = pneg %p1310_p7 }
 0x158   : > { %p1316_p12 = pnand %p1315_p11, %p1311_p8 }
 0x15a   : > { %1319 = shalt.err (!%p1316_p12)
}
 0x15b   : > { %1249 = dma.vmem_to_hbm [thread:$0]  (%p1437_p5), %s1039_s14, 128, %s1036_s17, %s1024_s18  }
 0x15c PF: > { %p1255_p13 = scmp.ge.s32.totalorder %s1354_s26, 2  ;;  %s1050_s12 = sand.u32 1, %s1342_s23  }
 0x15d   : > { %s1051_s13 = scalar_lea.sflag [#allocation4], %s1050_s12 }
 0x15e   : > { %p1252_p0 = pnand %p1255_p13, %p1441_p6 }
 0x160   : > { %p1253_p1 = pneg %p1252_p0 }
 0x162   : > { %1337 = dma.done.wait (%p1253_p1), %s1051_s13, 128  }
 0x163   : > { %1339 = vsyncadd (%p1253_p1), %s1051_s13, 4294967168  ;;  %p17_p2 = scmp.ge.s32.totalorder %s1424_s28, 4   ;;  %s1789_s23 = smov %s1346_s24 }
 0x164   : > { %s1790_s24 = smov %s1350_s25  ;;  %s1791_s25 = smov %s1435_s7 }
 0x165   : > { %s1792_s26 = smov %s1424_s28  ;;  %19 = sbr.rel (!%p17_p2) target bundleno = 5 (0x5), region = 83 }
 0x16a   :  { %1056 = vsyncpa [#allocation4], 1 }
 0x16b   :  { %1058 = vsyncpa [#allocation4 + $0x1], 1 }

</bundles_post_ra>
